<compile_context>
chip_gen: v6e
topology: v6e:2x2x1
jax: 0.10.0
libtpu: 0.0.40
codegen_flags: <defaults>
</compile_context>

<pallas_src>
import jax
import jax.numpy as jnp
from jax.experimental import pallas as pl
from jax.experimental.pallas import tpu as pltpu

_LANE = 128


def _round_up(x, m):
    return ((x + m - 1) // m) * m


def _embedding_transform_kernel(x_ref, w1_ref, b1_ref, w2_ref, b2_ref, o_ref):
    # x_ref: (bm, input_size) batch tile.  Weights already carry the folded
    # BatchNorm affine + Linear bias, so the forward is two matmuls + ReLU.
    x = x_ref[...]

    h = jnp.dot(x.astype(w1_ref.dtype), w1_ref[...],
                preferred_element_type=jnp.float32)
    h = jnp.maximum(h + b1_ref[...], 0.0)          # f32 epilogue

    y = jnp.dot(h.astype(w2_ref.dtype), w2_ref[...],
                preferred_element_type=jnp.float32)
    o_ref[...] = (y + b2_ref[...]).astype(o_ref.dtype)


def fold_params(raw, eps=1e-5, param_dtype=jnp.float32):
    """Fold eval-mode BatchNorm + Linear bias into the weights, transpose to
    [in, out] layout.  Only the internal hidden dim is padded to 128 lanes;
    input/output feature dims keep their true width so the wrapper never pads
    x or slices columns off the output.

    On v5e pass param_dtype=jnp.bfloat16 (bf16-native MXU); on v6e/v7x bf16
    also halves the resident-weight footprint / HBM traffic.
    """
    w1, b1 = raw["w1"], raw["b1"]          # [hidden, input], [hidden]
    w2, b2 = raw["w2"], raw["b2"]          # [out, hidden],   [out]

    s1 = raw["bn1_gamma"] / jnp.sqrt(raw["bn1_var"] + eps)
    sh1 = raw["bn1_beta"] - raw["bn1_mean"] * s1
    s2 = raw["bn2_gamma"] / jnp.sqrt(raw["bn2_var"] + eps)
    sh2 = raw["bn2_beta"] - raw["bn2_mean"] * s2

    # (x @ W^T + b) * s + sh  ==  x @ (W^T * s) + (b * s + sh)
    w1f = (w1.T * s1[None, :]).astype(param_dtype)        # [input, hidden]
    b1f = (b1 * s1 + sh1)[None, :].astype(jnp.float32)    # [1, hidden]
    w2f = (w2.T * s2[None, :]).astype(param_dtype)        # [hidden, out]
    b2f = (b2 * s2 + sh2)[None, :].astype(jnp.float32)    # [1, out]

    in_size, hid = w1f.shape
    out_size = w2f.shape[1]
    hid_p = _round_up(hid, _LANE)

    w1p = jnp.zeros((in_size, hid_p), param_dtype).at[:, :hid].set(w1f)
    b1p = jnp.zeros((1, hid_p), jnp.float32).at[:, :hid].set(b1f)
    w2p = jnp.zeros((hid_p, out_size), param_dtype).at[:hid, :].set(w2f)

    return dict(w1=w1p, b1=b1p, w2=w2p, b2=b2f,
                in_size=in_size, out_size=out_size)


def _vmem_ceiling_bytes():
    """~80% of this chip's physical VMEM (v5e/v6e: 128 MiB, v7x: 64 MiB).
    Never request the full capacity: the compiler needs internal scratch."""
    try:
        cap = getattr(pltpu.get_tpu_info(), "vmem_capacity_bytes", None)
        if cap:
            return int(cap * 0.8)
    except Exception:
        pass
    return int((64 << 20) * 0.8)     # conservative (v7x) fallback


def embedding_transform(x, folded, *, bm=1024):
    """x: [B, input_size].  folded: output of fold_params.

    bm is the requested batch tile (512-1024 puts the mem-bound path at the
    measured ~85% HBM-roofline regime); it is shrunk for tiny batches, kept to
    >= 2 grid steps (v7x has 2 TensorCores) and auto-shrunk to fit VMEM.
    """
    B, input_size = x.shape
    w1, b1, w2, b2 = folded["w1"], folded["b1"], folded["w2"], folded["b2"]
    in_sz, hid_p = w1.shape
    out_size = w2.shape[1]
    assert input_size == in_sz == folded["in_size"]
    assert out_size == folded["out_size"]

    # bf16 sublane tiling is (16,128); f32 is (8,128).
    sub = 16 if w1.dtype == jnp.bfloat16 else 8

    # Batch tile: large, but at least 2 grid steps for megacore balance and
    # shrunk (not over-padded) for tiny batches.
    bm = min(bm, max(sub, _round_up(pl.cdiv(B, 2), sub)))

    weight_bytes = sum(a.size * a.dtype.itemsize for a in (w1, b1, w2, b2))
    x_item = x.dtype.itemsize
    ceiling = _vmem_ceiling_bytes()

    def vmem_needed(tile):
        return (2 * tile * input_size * x_item   # x tile (double-buffered)
                + 2 * tile * out_size * 4        # out tile (double-buffered)
                + weight_bytes                   # resident weights, Buffered(1)
                + tile * hid_p * 4)              # intermediate h

    # Shrink bm until the (2x headroom) tile budget fits this chip's VMEM.
    while bm > sub and 2 * vmem_needed(bm) > ceiling:
        bm = max(sub, _round_up(bm // 2, sub))
    vmem_limit = int(min(max(2 * vmem_needed(bm), 16 << 20), ceiling))

    Bp = _round_up(B, bm)
    xp = x if Bp == B else jnp.pad(x, ((0, Bp - B), (0, 0)))

    grid = (Bp // bm,)
    flops = 2 * Bp * (input_size * hid_p + hid_p * out_size)
    bytes_accessed = (Bp * input_size * x_item + weight_bytes
                      + Bp * out_size * 4)

    # TODO(synk): for weights too large to stay resident (>~1/4 of VMEM), add
    # a "parallel" grid axis over output columns (and an "arbitrary" K axis
    # with a VMEM f32 accumulator) instead of shrinking bm.
    def _call(buffered_weights):
        if buffered_weights:
            # Grid-invariant inputs: a single resident buffer is enough.
            resident = lambda shape: pl.BlockSpec(
                shape, lambda i: (0, 0), pipeline_mode=pl.Buffered(1))
        else:
            resident = lambda shape: pl.BlockSpec(shape, lambda i: (0, 0))
        return pl.pallas_call(
            _embedding_transform_kernel,
            out_shape=jax.ShapeDtypeStruct((Bp, out_size), jnp.float32),
            grid=grid,
            in_specs=[
                pl.BlockSpec((bm, input_size), lambda i: (i, 0)),  # x tile
                resident((input_size, hid_p)),                     # folded W1
                resident((1, hid_p)),                              # folded b1
                resident((hid_p, out_size)),                       # folded W2
                resident((1, out_size)),                           # folded b2
            ],
            out_specs=pl.BlockSpec((bm, out_size), lambda i: (i, 0)),
            compiler_params=pltpu.CompilerParams(
                dimension_semantics=("parallel",),       # megacore-shardable
                vmem_limit_bytes=vmem_limit),
            cost_estimate=pl.CostEstimate(
                flops=flops, transcendentals=0, bytes_accessed=bytes_accessed),
        )(xp, w1, b1, w2, b2)

    try:
        out = _call(buffered_weights=True)
    except Exception:
        # Fallback if this JAX build rejects pipeline_mode=Buffered(1); the
        # kernel is identical, weights are just double-buffered.
        out = _call(buffered_weights=False)

    return out if Bp == B else out[:B]


def make_params(key, input_size, hidden_size, out_size):
    """Deterministic synthetic PyTorch-layout parameters."""
    ks = jax.random.split(key, 12)
    n = jax.random.normal
    return dict(
        w1=n(ks[0], (hidden_size, input_size), jnp.float32) * 0.05,
        b1=n(ks[1], (hidden_size,), jnp.float32) * 0.01,
        bn1_gamma=1.0 + 0.1 * n(ks[2], (hidden_size,), jnp.float32),
        bn1_beta=0.1 * n(ks[3], (hidden_size,), jnp.float32),
        bn1_mean=0.05 * n(ks[4], (hidden_size,), jnp.float32),
        bn1_var=jnp.abs(1.0 + 0.1 * n(ks[5], (hidden_size,), jnp.float32)),
        w2=n(ks[6], (out_size, hidden_size), jnp.float32) * 0.05,
        b2=n(ks[7], (out_size,), jnp.float32) * 0.01,
        bn2_gamma=1.0 + 0.1 * n(ks[8], (out_size,), jnp.float32),
        bn2_beta=0.1 * n(ks[9], (out_size,), jnp.float32),
        bn2_mean=0.05 * n(ks[10], (out_size,), jnp.float32),
        bn2_var=jnp.abs(1.0 + 0.1 * n(ks[11], (out_size,), jnp.float32)),
    )


def reference(x, p, eps=1e-5):
    """Plain-JAX eval-mode forward pass (dropout = identity)."""
    h = x @ p["w1"].T + p["b1"]
    h = (h - p["bn1_mean"]) / jnp.sqrt(p["bn1_var"] + eps) * p["bn1_gamma"] + p["bn1_beta"]
    h = jnp.maximum(h, 0.0)
    y = h @ p["w2"].T + p["b2"]
    y = (y - p["bn2_mean"]) / jnp.sqrt(p["bn2_var"] + eps) * p["bn2_gamma"] + p["bn2_beta"]
    return y


if __name__ == "__main__":
    # TODO(synk): dropout & BatchNorm training-mode (batch statistics) are not
    # implemented; this kernel reproduces eval-mode forward semantics.
    B, input_size, hidden_size, out_size = 16, 32, 64, 32

    key = jax.random.PRNGKey(0)
    kx, kp = jax.random.split(key)
    x = jax.random.normal(kx, (B, input_size), jnp.float32)
    raw = make_params(kp, input_size, hidden_size, out_size)
    ref = reference(x, raw)

    # f32 weights: exact eval-mode semantics (tight tolerance).
    out = jax.block_until_ready(embedding_transform(x, fold_params(raw)))
    assert out.shape == (B, out_size)
    assert jnp.allclose(out, ref, atol=1e-4, rtol=1e-4), "f32 mismatch vs reference"

    # bf16 weights: MXU fast path (recommended default on v5e); f32 accumulate.
    out_bf16 = jax.block_until_ready(
        embedding_transform(x, fold_params(raw, param_dtype=jnp.bfloat16)))
    assert out_bf16.shape == (B, out_size)
    assert jnp.allclose(out_bf16, ref, atol=5e-2, rtol=5e-2), "bf16 mismatch vs reference"

    # Ragged batch (exercises the B % bm != 0 pad + row-slice path).
    xr = x[:13]
    out_r = jax.block_until_ready(embedding_transform(xr, fold_params(raw)))
    assert out_r.shape == (13, out_size)
    assert jnp.allclose(out_r, ref[:13], atol=1e-4, rtol=1e-4), "ragged mismatch"

    print("KERNEL_OK")
</pallas_src>

<mosaic_0001>
module attributes {stable_mosaic.version = 11 : i64} {
  func.func @_embedding_transform_kernel(%arg0: i32, %arg1: memref<8x32xf32, #tpu.memory_space<vmem>>, %arg2: memref<32x128xf32, #tpu.memory_space<vmem>>, %arg3: memref<1x128xf32, #tpu.memory_space<vmem>>, %arg4: memref<128x32xf32, #tpu.memory_space<vmem>>, %arg5: memref<1x32xf32, #tpu.memory_space<vmem>>, %arg6: memref<8x32xf32, #tpu.memory_space<vmem>>) attributes {dimension_semantics = [#tpu.dimension_semantics<parallel>], iteration_bounds = array<i64: 2>, scalar_prefetch = 0 : i64, scratch_operands = 0 : i64, tpu.core_type = #tpu.core_type<tc>, window_params = [{transform_indices = @transform_0, window_bounds = array<i64: 8, 32>}, {pipeline_mode = #tpu.pipeline_mode<synchronous>, transform_indices = @transform_1, window_bounds = array<i64: 32, 128>}, {pipeline_mode = #tpu.pipeline_mode<synchronous>, transform_indices = @transform_2, window_bounds = array<i64: 1, 128>}, {pipeline_mode = #tpu.pipeline_mode<synchronous>, transform_indices = @transform_3, window_bounds = array<i64: 128, 32>}, {pipeline_mode = #tpu.pipeline_mode<synchronous>, transform_indices = @transform_4, window_bounds = array<i64: 1, 32>}, {transform_indices = @transform_5, window_bounds = array<i64: 8, 32>}]} {
    %c0 = arith.constant 0 : index
    %c0_0 = arith.constant 0 : index
    %0 = vector.load %arg1[%c0, %c0_0] : memref<8x32xf32, #tpu.memory_space<vmem>>, vector<8x32xf32>
    %c0_1 = arith.constant 0 : index
    %c0_2 = arith.constant 0 : index
    %1 = vector.load %arg2[%c0_1, %c0_2] : memref<32x128xf32, #tpu.memory_space<vmem>>, vector<32x128xf32>
    %cst = arith.constant dense<0.000000e+00> : vector<8x128xf32>
    %2 = tpu.matmul %0, %1, %cst {dimension_numbers = #tpu.dot_dimension_numbers<[1], [0], [0], [1], [0, 0, 1, 1], [], []>} : vector<8x32xf32>, vector<32x128xf32>, vector<8x128xf32> -> vector<8x128xf32>
    %c0_3 = arith.constant 0 : index
    %c0_4 = arith.constant 0 : index
    %3 = vector.load %arg3[%c0_3, %c0_4] : memref<1x128xf32, #tpu.memory_space<vmem>>, vector<1x128xf32>
    %4 = vector.broadcast %3 : vector<1x128xf32> to vector<8x128xf32>
    %5 = arith.addf %2, %4 : vector<8x128xf32>
    %cst_5 = arith.constant 0.000000e+00 : f32
    %6 = vector.broadcast %cst_5 : f32 to vector<8x128xf32>
    %7 = arith.maximumf %5, %6 : vector<8x128xf32>
    %c0_6 = arith.constant 0 : index
    %c0_7 = arith.constant 0 : index
    %8 = vector.load %arg4[%c0_6, %c0_7] : memref<128x32xf32, #tpu.memory_space<vmem>>, vector<128x32xf32>
    %cst_8 = arith.constant dense<0.000000e+00> : vector<8x32xf32>
    %9 = tpu.matmul %7, %8, %cst_8 {dimension_numbers = #tpu.dot_dimension_numbers<[1], [0], [0], [1], [0, 0, 1, 1], [], []>} : vector<8x128xf32>, vector<128x32xf32>, vector<8x32xf32> -> vector<8x32xf32>
    %c0_9 = arith.constant 0 : index
    %c0_10 = arith.constant 0 : index
    %10 = vector.load %arg5[%c0_9, %c0_10] : memref<1x32xf32, #tpu.memory_space<vmem>>, vector<1x32xf32>
    %11 = vector.broadcast %10 : vector<1x32xf32> to vector<8x32xf32>
    %12 = arith.addf %9, %11 : vector<8x32xf32>
    %c0_11 = arith.constant 0 : index
    %c0_12 = arith.constant 0 : index
    %13 = vector.load %arg6[%c0_11, %c0_12] : memref<8x32xf32, #tpu.memory_space<vmem>>, vector<8x32xf32>
    tpu.vector_store %arg6[%c0_11, %c0_12], %12 {strides = array<i32>} : memref<8x32xf32, #tpu.memory_space<vmem>>, vector<8x32xf32>,
    return
  }
  func.func @transform_0(%arg0: i32) -> (i32, i32) {
    %c0_i32 = arith.constant 0 : i32
    %c0_i32_0 = arith.constant 0 : i32
    return %arg0, %c0_i32 : i32, i32
  }
  func.func @transform_1(%arg0: i32) -> (i32, i32) {
    %c0_i32 = arith.constant 0 : i32
    %c0_i32_0 = arith.constant 0 : i32
    %c0_i32_1 = arith.constant 0 : i32
    return %c0_i32, %c0_i32_0 : i32, i32
  }
  func.func @transform_2(%arg0: i32) -> (i32, i32) {
    %c0_i32 = arith.constant 0 : i32
    %c0_i32_0 = arith.constant 0 : i32
    %c0_i32_1 = arith.constant 0 : i32
    return %c0_i32, %c0_i32_0 : i32, i32
  }
  func.func @transform_3(%arg0: i32) -> (i32, i32) {
    %c0_i32 = arith.constant 0 : i32
    %c0_i32_0 = arith.constant 0 : i32
    %c0_i32_1 = arith.constant 0 : i32
    return %c0_i32, %c0_i32_0 : i32, i32
  }
  func.func @transform_4(%arg0: i32) -> (i32, i32) {
    %c0_i32 = arith.constant 0 : i32
    %c0_i32_0 = arith.constant 0 : i32
    %c0_i32_1 = arith.constant 0 : i32
    return %c0_i32, %c0_i32_0 : i32, i32
  }
  func.func @transform_5(%arg0: i32) -> (i32, i32) {
    %c0_i32 = arith.constant 0 : i32
    %c0_i32_0 = arith.constant 0 : i32
    return %arg0, %c0_i32 : i32, i32
  }
}

module attributes {stable_mosaic.version = 11 : i64} {
  func.func @_embedding_transform_kernel(%arg0: i32, %arg1: memref<8x32xf32, #tpu.memory_space<vmem>>, %arg2: memref<32x128xf32, #tpu.memory_space<vmem>>, %arg3: memref<1x128xf32, #tpu.memory_space<vmem>>, %arg4: memref<128x32xf32, #tpu.memory_space<vmem>>, %arg5: memref<1x32xf32, #tpu.memory_space<vmem>>, %arg6: memref<8x32xf32, #tpu.memory_space<vmem>>) attributes {dimension_semantics = [#tpu.dimension_semantics<parallel>], iteration_bounds = array<i64: 2>, scalar_prefetch = 0 : i64, scratch_operands = 0 : i64, tpu.core_type = #tpu.core_type<tc>, window_params = [{transform_indices = @transform_0, window_bounds = array<i64: 8, 32>}, {pipeline_mode = #tpu.pipeline_mode<synchronous>, transform_indices = @transform_1, window_bounds = array<i64: 32, 128>}, {pipeline_mode = #tpu.pipeline_mode<synchronous>, transform_indices = @transform_2, window_bounds = array<i64: 1, 128>}, {pipeline_mode = #tpu.pipeline_mode<synchronous>, transform_indices = @transform_3, window_bounds = array<i64: 128, 32>}, {pipeline_mode = #tpu.pipeline_mode<synchronous>, transform_indices = @transform_4, window_bounds = array<i64: 1, 32>}, {transform_indices = @transform_5, window_bounds = array<i64: 8, 32>}]} {
    %c0 = arith.constant 0 : index
    %c0_0 = arith.constant 0 : index
    %0 = vector.load %arg1[%c0, %c0_0] : memref<8x32xf32, #tpu.memory_space<vmem>>, vector<8x32xf32>
    %c0_1 = arith.constant 0 : index
    %c0_2 = arith.constant 0 : index
    %1 = vector.load %arg2[%c0_1, %c0_2] : memref<32x128xf32, #tpu.memory_space<vmem>>, vector<32x128xf32>
    %cst = arith.constant dense<0.000000e+00> : vector<8x128xf32>
    %2 = tpu.matmul %0, %1, %cst {dimension_numbers = #tpu.dot_dimension_numbers<[1], [0], [0], [1], [0, 0, 1, 1], [], []>} : vector<8x32xf32>, vector<32x128xf32>, vector<8x128xf32> -> vector<8x128xf32>
    %c0_3 = arith.constant 0 : index
    %c0_4 = arith.constant 0 : index
    %3 = vector.load %arg3[%c0_3, %c0_4] : memref<1x128xf32, #tpu.memory_space<vmem>>, vector<1x128xf32>
    %4 = vector.broadcast %3 : vector<1x128xf32> to vector<8x128xf32>
    %5 = arith.addf %2, %4 : vector<8x128xf32>
    %cst_5 = arith.constant 0.000000e+00 : f32
    %6 = vector.broadcast %cst_5 : f32 to vector<8x128xf32>
    %7 = arith.maximumf %5, %6 : vector<8x128xf32>
    %c0_6 = arith.constant 0 : index
    %c0_7 = arith.constant 0 : index
    %8 = vector.load %arg4[%c0_6, %c0_7] : memref<128x32xf32, #tpu.memory_space<vmem>>, vector<128x32xf32>
    %cst_8 = arith.constant dense<0.000000e+00> : vector<8x32xf32>
    %9 = tpu.matmul %7, %8, %cst_8 {dimension_numbers = #tpu.dot_dimension_numbers<[1], [0], [0], [1], [0, 0, 1, 1], [], []>} : vector<8x128xf32>, vector<128x32xf32>, vector<8x32xf32> -> vector<8x32xf32>
    %c0_9 = arith.constant 0 : index
    %c0_10 = arith.constant 0 : index
    %10 = vector.load %arg5[%c0_9, %c0_10] : memref<1x32xf32, #tpu.memory_space<vmem>>, vector<1x32xf32>
    %11 = vector.broadcast %10 : vector<1x32xf32> to vector<8x32xf32>
    %12 = arith.addf %9, %11 : vector<8x32xf32>
    %c0_11 = arith.constant 0 : index
    %c0_12 = arith.constant 0 : index
    %13 = vector.load %arg6[%c0_11, %c0_12] : memref<8x32xf32, #tpu.memory_space<vmem>>, vector<8x32xf32>
    tpu.vector_store %arg6[%c0_11, %c0_12], %12 {strides = array<i32>} : memref<8x32xf32, #tpu.memory_space<vmem>>, vector<8x32xf32>,
    return
  }
  func.func @transform_0(%arg0: i32) -> (i32, i32) {
    %c0_i32 = arith.constant 0 : i32
    %c0_i32_0 = arith.constant 0 : i32
    return %arg0, %c0_i32 : i32, i32
  }
  func.func @transform_1(%arg0: i32) -> (i32, i32) {
    %c0_i32 = arith.constant 0 : i32
    %c0_i32_0 = arith.constant 0 : i32
    %c0_i32_1 = arith.constant 0 : i32
    return %c0_i32, %c0_i32_0 : i32, i32
  }
  func.func @transform_2(%arg0: i32) -> (i32, i32) {
    %c0_i32 = arith.constant 0 : i32
    %c0_i32_0 = arith.constant 0 : i32
    %c0_i32_1 = arith.constant 0 : i32
    return %c0_i32, %c0_i32_0 : i32, i32
  }
  func.func @transform_3(%arg0: i32) -> (i32, i32) {
    %c0_i32 = arith.constant 0 : i32
    %c0_i32_0 = arith.constant 0 : i32
    %c0_i32_1 = arith.constant 0 : i32
    return %c0_i32, %c0_i32_0 : i32, i32
  }
  func.func @transform_4(%arg0: i32) -> (i32, i32) {
    %c0_i32 = arith.constant 0 : i32
    %c0_i32_0 = arith.constant 0 : i32
    %c0_i32_1 = arith.constant 0 : i32
    return %c0_i32, %c0_i32_0 : i32, i32
  }
  func.func @transform_5(%arg0: i32) -> (i32, i32) {
    %c0_i32 = arith.constant 0 : i32
    %c0_i32_0 = arith.constant 0 : i32
    return %arg0, %c0_i32 : i32, i32
  }
}

</mosaic_0001>

<bundles_post_ra>
// kernel: tpu_custom_call.1
= control target key start
LH: loop header
LB: loop body
LE: loop exit
PB: predicated region body
PF: predicated region fallthrough
CT: control target
= control target key end

     0   :  { %10 = vsyncpa [#allocation3], 0  ;;  %s876_s0 = inlined_call_operand.vmem [shape: f32[16,32], index: 0, kind: input, shape index: {}]   ;;  %s877_s1 = inlined_call_operand.vmem [shape: f32[32,128], index: 1, kind: input, shape index: {}]   ;;  %s878_s2 = inlined_call_operand.vmem [shape: f32[1,128], index: 2, kind: input, shape index: {}]   ;;  %s879_s3 = inlined_call_operand.vmem [shape: f32[128,32], index: 3, kind: input, shape index: {}]   ;;  %s880_s4 = inlined_call_operand.vmem [shape: f32[1,32], index: 4, kind: input, shape index: {}]   ;;  %s881_s5 = inlined_call_operand.hbm [shape: f32[16,32], index: 5, kind: output, shape index: {}]  }
   0x1   :  { %12 = vsyncpa [#allocation3 + $0x1], 0  ;;  %s691_s18 = smov 0   ;;  %s693_s19 = smov 0  }
   0x2   :  { %s695_s20 = smov 0   ;;  %s697_s21 = smov 0  }
   0x3 LB: > { %s712_s22 = sadd.s32 4294967295, %s656_s21   ;;  %s474_s23 = sadd.s32 4294967294, %s656_s21   ;;  %s656_s21 = sphi %s697_s21, %s887_s21   ;;  %s652_s20 = sphi %s695_s20, %s886_s20   ;;  %s648_s19 = sphi %s693_s19, %s885_s19   ;;  %s644_s18 = sphi %s691_s18, %s884_s18  }
   0x4   : > { %s716_s24 = sadd.s32 1, %s656_s21   ;;  %s135_s25 = sadd.s32 1, %s652_s20 }
   0x5   : > { %s132_s26 = ssub.s32 %s656_s21, %s716_s24  ;;  %p145_p0 = scmp.ne.s32.totalorder %s652_s20, %s648_s19 }
   0x6   : > { %p133_p1 = scmp.eq.s32.totalorder %s132_s26, 0  ;;  %p146_p2 = scmp.eq.s32.totalorder %s712_s22, 1 }
   0x7   : > { %p151_p3 = scmp.ne.s32.totalorder %s648_s19, %s644_s18  ;;  %p152_p4 = scmp.eq.s32.totalorder %s474_s23, 1 }
   0x8   : > { %s727_s27 = scalar_select %p133_p1, %s652_s20, %s135_s25  }
   0x9   : > { %p729_p5 = por %p146_p2, %p145_p0  ;;  %p733_p6 = por %p152_p4, %p151_p3 }
   0xa   : > { %p477_p7 = scmp.ge.s32.totalorder %s656_s21, 1  ;;  %p189_p8 = scmp.lt.s32.totalorder %s656_s21, 3 }
   0xc   : > { %p190_p9 = pnand %p477_p7, %p189_p8 }
   0xd   : > { %p216_p10 = scmp.lt.s32.totalorder (!%p190_p9), %s712_s22, 1  ;;  %s213_s26 = sand.u32 (!%p190_p9), 1, %s648_s19  }
   0xe   : > { %193 = sbr.rel (%p190_p9) target bundleno = 433 (0x1b1), region = 40  ;;  %s478_s30 = sshll.u32 (!%p190_p9), %s213_s26, 3 }
   0xf   : > { %s484_s8 = sshll.u32 (!%p190_p9), %s712_s22, 7  ;;  %s215_s9 = scalar_lea.vmem (!%p190_p9), [#allocation2], %s478_s30 }
  0x10   : > { %s415_s10 = sshll.u32 (!%p190_p9), %s215_s9, 4  ;;  %s840_s13 = scalar_lea.hbm (!%p190_p9), %s881_s5, %s484_s8  ;;  %s416_s10 = int_to_ptr.vmem [resolvable:$true] %s415_s10 }
  0x11   : > { %s402_s14 = scalar_lea.sflag (!%p190_p9), [#allocation3], %s213_s26  ;;  %s596_s15 = scalar_lea.vmem (!%p190_p9), %s416_s10, 128 }
  0x12   : > { %p597_p11 = scmp.ne.s32.totalorder (!%p190_p9), %s416_s10, %s596_s15 }
  0x13   : > { %v224_v0 = vld [vmem:[%s877_s1 + $0x18] sm:$0xff]  ;;  %v658_v1 = vmov 0.0   ;;  %v223_v2 = vld [vmem:[%s877_s1 + $0x10] sm:$0xff]  ;;  %vm659_vm0 = vmmov 0   ;;  %s217_s11 = scalar_select %p216_p10, %s712_s22, 1  ;;  %v222_v5 = vld [vmem:[%s877_s1 + $0x8] sm:$0xff] }
  0x14   : > { %509 = vmatprep.subr.mxu0 %v658_v1  ;;  %517 = vmatprep.mubr.msk.f32.mxu0 %vm659_vm0, %v658_v1  ;;  %v322_v3 = vld [vmem:[%s879_s3 + $0x78] sm:$0xff]  ;;  %v321_v4 = vld [vmem:[%s879_s3 + $0x70] sm:$0xff]  ;;  %v320_v6 = vld [vmem:[%s879_s3 + $0x68] sm:$0xff]  ;;  %vm232_vm1 = vcmask 261120   ;;  %p598_p12 = pnand %p597_p11, %p729_p5  ;;  %s660_s22 = smov [#allocation2]  }
  0x15   : > { %510 = vmatpush3.msra.mxu0 %v224_v0  ;;  %520 = vmatprep.subr.mxu1 %v658_v1  ;;  %s479_s16 = sshll.u32 %s217_s11, 3  ;;  %v221_v7 = vld [vmem:[%s877_s1] sm:$0xff]  ;;  %v318_v10 = vld [vmem:[%s879_s3 + $0x58] sm:$0xff]  ;;  %v317_v11 = vld [vmem:[%s879_s3 + $0x50] sm:$0xff] }
  0x16   : > { %511 = vmatprep.subr.mxu0 %v658_v1  ;;  %521 = vmatpush3.msra.mxu1 %v322_v3  ;;  %s219_s7 = scalar_lea.vmem %s876_s0, %s479_s16  ;;  %v319_v9 = vld [vmem:[%s879_s3 + $0x60] sm:$0xff]  ;;  %v316_v12 = vld [vmem:[%s879_s3 + $0x48] sm:$0xff]  ;;  %v314_v14 = vld [vmem:[%s879_s3 + $0x38] sm:$0xff]  ;;  %p599_p13 = pneg %p598_p12 }
  0x17   : > { %512 = vmatpush3.msra.mxu0 %v223_v2  ;;  %522 = vmatprep.subr.mxu1 %v658_v1  ;;  %v220_v8 = vld [vmem:[%s219_s7] sm:$0xff]  ;;  %v313_v15 = vld [vmem:[%s879_s3 + $0x30] sm:$0xff]  ;;  %v312_v16 = vld [vmem:[%s879_s3 + $0x28] sm:$0xff]  ;;  %s600_s16 = sshll.u32 %s660_s22, 4  ;;  %s601_s16 = int_to_ptr.vmem [resolvable:$false] %s600_s16 }
  0x18   : > { %513 = vmatprep.subr.mxu0 %v658_v1  ;;  %523 = vmatpush3.msra.mxu1 %v321_v4  ;;  %v315_v13 = vld [vmem:[%s879_s3 + $0x40] sm:$0xff]  ;;  %v310_v18 = vld [vmem:[%s879_s3 + $0x18] sm:$0xff]  ;;  %v309_v19 = vld [vmem:[%s879_s3 + $0x10] sm:$0xff]  ;;  %s602_s17 = scalar_lea.vmem %s601_s16, 256  ;;  %p603_p0 = scmp.lt.s32.totalorder %s416_s10, %s601_s16 }
  0x19   : > { %514 = vmatpush3.msra.mxu0 %v222_v5  ;;  %524 = vmatprep.subr.mxu1 %v658_v1  ;;  %v311_v17 = vld [vmem:[%s879_s3 + $0x20] sm:$0xff]  ;;  %v308_v20 = vld [vmem:[%s879_s3 + $0x8] sm:$0xff]  ;;  %p604_p1 = scmp.lt.s32.totalorder %s602_s17, %s596_s15 }
  0x1a   : > { %515 = vmatprep.subr.mxu0 %v658_v1  ;;  %525 = vmatpush3.msra.mxu1 %v320_v6  ;;  %v307_v21 = vld [vmem:[%s879_s3] sm:$0xff] }
  0x1b   : > { %516 = vmatpush3.msra.mxu0 %v221_v7  ;;  %526 = vmatprep.subr.mxu1 %v658_v1  ;;  %v480_v22 = vld [vmem:[%s878_s2] ss:$0 sm:$0xff]  ;;  %p605_p2 = por %p604_p1, %p603_p0 }
  0x1c   : > { %518 = vmatmul.mubr.msk.f32.vlgmr.msra.gmra.mxu0 %vm232_vm1, %v220_v8  ;;  %527 = vmatpush3.msra.mxu1 %v319_v9  ;;  %v482_v27 = vld [vmem:[%s880_s4] ss:$0 sm:$0xff] }
  0x1d   : > { %528 = vmatprep.subr.mxu1 %v658_v1  ;;  %552 = vmatprep.mubr.msk.f32.mxu1 %vm659_vm0, %v658_v1  ;;  %p606_p3 = pnand %p605_p2, %p599_p13 }
  0x1e   : > { %529 = vmatpush3.msra.mxu1 %v318_v10 }
  0x1f   : > { %530 = vmatprep.subr.mxu1 %v658_v1 }
  0x20   : > { %531 = vmatpush3.msra.mxu1 %v317_v11 }
  0x21   : > { %532 = vmatprep.subr.mxu1 %v658_v1 }
  0x22   : > { %533 = vmatpush3.msra.mxu1 %v316_v12 }
  0x23   : > { %534 = vmatprep.subr.mxu1 %v658_v1 }
  0x24   : > { %535 = vmatpush3.msra.mxu1 %v315_v13 }
  0x25   : > { %536 = vmatprep.subr.mxu1 %v658_v1 }
  0x26   : > { %537 = vmatpush3.msra.mxu1 %v314_v14 }
  0x27   : > { %538 = vmatprep.subr.mxu1 %v658_v1 }
  0x28   : > { %539 = vmatpush3.msra.mxu1 %v313_v15 }
  0x29   : > { %540 = vmatprep.subr.mxu1 %v658_v1 }
  0x2a   : > { %541 = vmatpush3.msra.mxu1 %v312_v16 }
  0x2b   : > { %542 = vmatprep.subr.mxu1 %v658_v1 }
  0x2c   : > { %543 = vmatpush3.msra.mxu1 %v311_v17 }
  0x2d   : > { %544 = vmatprep.subr.mxu1 %v658_v1 }
  0x2e   : > { %545 = vmatpush3.msra.mxu1 %v310_v18 }
  0x2f   : > { %546 = vmatprep.subr.mxu1 %v658_v1 }
  0x30   : > { %547 = vmatpush3.msra.mxu1 %v309_v19 }
  0x31   : > { %548 = vmatprep.subr.mxu1 %v658_v1 }
  0x32   : > { %549 = vmatpush3.msra.mxu1 %v308_v20 }
  0x33   : > { %550 = vmatprep.subr.mxu1 %v658_v1 }
  0x34   : > { %551 = vmatpush3.msra.mxu1 %v307_v21 }
  0xdc   : > { %v302_v23 = vpop.f32.mrf.mxu0 }
  0xdd   : > { %v303_v24 = vadd.f32 %v480_v22, %v302_v23 }
  0xde   : > { %v519_v25 = vpop.f32.mrf.mxu0 }
  0xdf   : > { %v306_v26 = vmax.f32 %v303_v24, 0.0 }
  0xe1   : > { %553 = vmatmul.mubr.f32.vlgmr.msra.gmra.mxu1 %v306_v26 }
 0x1a1   : > { %v396_v28 = vpop.f32.mrf.mxu1 }
 0x1a2   : > { %v397_v29 = vadd.f32 %v482_v27, %v396_v28 }
 0x1a3   : > { %v554_v30 = vpop.f32.mrf.mxu1 }
 0x1a4   : > { %400 = vst.msk [vmem:[%s215_s9] sm:$0xff] %vm232_vm1, %v397_v29 }
 0x1a5   : > { %609 = shalt.err (!%p606_p3)
}
 0x1a6   : > { %s610_s23 = scalar_lea.hbm %s840_s13, 128  ;;  %s614_s30 = scalar_lea.hbm %s881_s5, 256 }
 0x1a7   : > { %p611_p4 = scmp.ne.s32.totalorder %s840_s13, %s610_s23  ;;  %p615_p9 = scmp.lt.s32.totalorder %s840_s13, %s881_s5 }
 0x1a8   : > { %p616_p10 = scmp.lt.s32.totalorder %s614_s30, %s610_s23 }
 0x1a9   : > { %p612_p7 = pnand %p611_p4, %p729_p5 }
 0x1aa   : > { %p617_p11 = por %p616_p10, %p615_p9 }
 0x1ab   : > { %p613_p8 = pneg %p612_p7 }
 0x1ad   : > { %p618_p12 = pnand %p617_p11, %p613_p8 }
 0x1af   : > { %621 = shalt.err (!%p618_p12)
}
 0x1b0   : > { %555 = dma.vmem_to_hbm [thread:$0]  (%p729_p5), %s416_s10, 128, %s840_s13, %s402_s14  }
 0x1b1 PF: > { %p561_p13 = scmp.ge.s32.totalorder %s656_s21, 2  ;;  %s427_s8 = sand.u32 1, %s644_s18  }
 0x1b2   : > { %s428_s9 = scalar_lea.sflag [#allocation3], %s427_s8 }
 0x1b3   : > { %p558_p0 = pnand %p561_p13, %p733_p6 }
 0x1b5   : > { %p559_p1 = pneg %p558_p0 }
 0x1b7   : > { %639 = dma.done.wait (%p559_p1), %s428_s9, 128  }
 0x1b8   : > { %641 = vsyncadd (%p559_p1), %s428_s9, 4294967168  ;;  %p15_p2 = scmp.ge.s32.totalorder %s716_s24, 4   ;;  %s884_s18 = smov %s648_s19 }
 0x1b9   : > { %s885_s19 = smov %s652_s20  ;;  %s886_s20 = smov %s727_s27 }
 0x1ba   : > { %s887_s21 = smov %s716_s24  ;;  %17 = sbr.rel (!%p15_p2) target bundleno = 3 (0x3), region = 75 }
 0x1bf   :  { %433 = vsyncpa [#allocation3], 1 }
 0x1c0   :  { %435 = vsyncpa [#allocation3 + $0x1], 1 }

// kernel: tpu_custom_call.1
= control target key start
LH: loop header
LB: loop body
LE: loop exit
PB: predicated region body
PF: predicated region fallthrough
CT: control target
= control target key end

     0   :  { %10 = vsyncpa [#allocation3], 0  ;;  %s876_s0 = inlined_call_operand.vmem [shape: f32[16,32], index: 0, kind: input, shape index: {}]   ;;  %s877_s1 = inlined_call_operand.vmem [shape: f32[32,128], index: 1, kind: input, shape index: {}]   ;;  %s878_s2 = inlined_call_operand.vmem [shape: f32[1,128], index: 2, kind: input, shape index: {}]   ;;  %s879_s3 = inlined_call_operand.vmem [shape: f32[128,32], index: 3, kind: input, shape index: {}]   ;;  %s880_s4 = inlined_call_operand.vmem [shape: f32[1,32], index: 4, kind: input, shape index: {}]   ;;  %s881_s5 = inlined_call_operand.hbm [shape: f32[16,32], index: 5, kind: output, shape index: {}]  }
   0x1   :  { %12 = vsyncpa [#allocation3 + $0x1], 0  ;;  %s691_s18 = smov 0   ;;  %s693_s19 = smov 0  }
   0x2   :  { %s695_s20 = smov 0   ;;  %s697_s21 = smov 0  }
   0x3 LB: > { %s712_s22 = sadd.s32 4294967295, %s656_s21   ;;  %s474_s23 = sadd.s32 4294967294, %s656_s21   ;;  %s656_s21 = sphi %s697_s21, %s887_s21   ;;  %s652_s20 = sphi %s695_s20, %s886_s20   ;;  %s648_s19 = sphi %s693_s19, %s885_s19   ;;  %s644_s18 = sphi %s691_s18, %s884_s18  }
   0x4   : > { %s716_s24 = sadd.s32 1, %s656_s21   ;;  %s135_s25 = sadd.s32 1, %s652_s20 }
   0x5   : > { %s132_s26 = ssub.s32 %s656_s21, %s716_s24  ;;  %p145_p0 = scmp.ne.s32.totalorder %s652_s20, %s648_s19 }
   0x6   : > { %p133_p1 = scmp.eq.s32.totalorder %s132_s26, 0  ;;  %p146_p2 = scmp.eq.s32.totalorder %s712_s22, 1 }
   0x7   : > { %p151_p3 = scmp.ne.s32.totalorder %s648_s19, %s644_s18  ;;  %p152_p4 = scmp.eq.s32.totalorder %s474_s23, 1 }
   0x8   : > { %s727_s27 = scalar_select %p133_p1, %s652_s20, %s135_s25  }
   0x9   : > { %p729_p5 = por %p146_p2, %p145_p0  ;;  %p733_p6 = por %p152_p4, %p151_p3 }
   0xa   : > { %p477_p7 = scmp.ge.s32.totalorder %s656_s21, 1  ;;  %p189_p8 = scmp.lt.s32.totalorder %s656_s21, 3 }
   0xc   : > { %p190_p9 = pnand %p477_p7, %p189_p8 }
   0xd   : > { %p216_p10 = scmp.lt.s32.totalorder (!%p190_p9), %s712_s22, 1  ;;  %s213_s26 = sand.u32 (!%p190_p9), 1, %s648_s19  }
   0xe   : > { %193 = sbr.rel (%p190_p9) target bundleno = 433 (0x1b1), region = 40  ;;  %s478_s30 = sshll.u32 (!%p190_p9), %s213_s26, 3 }
   0xf   : > { %s484_s8 = sshll.u32 (!%p190_p9), %s712_s22, 7  ;;  %s215_s9 = scalar_lea.vmem (!%p190_p9), [#allocation2], %s478_s30 }
  0x10   : > { %s415_s10 = sshll.u32 (!%p190_p9), %s215_s9, 4  ;;  %s840_s13 = scalar_lea.hbm (!%p190_p9), %s881_s5, %s484_s8  ;;  %s416_s10 = int_to_ptr.vmem [resolvable:$true] %s415_s10 }
  0x11   : > { %s402_s14 = scalar_lea.sflag (!%p190_p9), [#allocation3], %s213_s26  ;;  %s596_s15 = scalar_lea.vmem (!%p190_p9), %s416_s10, 128 }
  0x12   : > { %p597_p11 = scmp.ne.s32.totalorder (!%p190_p9), %s416_s10, %s596_s15 }
  0x13   : > { %v224_v0 = vld [vmem:[%s877_s1 + $0x18] sm:$0xff]  ;;  %v658_v1 = vmov 0.0   ;;  %v223_v2 = vld [vmem:[%s877_s1 + $0x10] sm:$0xff]  ;;  %vm659_vm0 = vmmov 0   ;;  %s217_s11 = scalar_select %p216_p10, %s712_s22, 1  ;;  %v222_v5 = vld [vmem:[%s877_s1 + $0x8] sm:$0xff] }
  0x14   : > { %509 = vmatprep.subr.mxu0 %v658_v1  ;;  %517 = vmatprep.mubr.msk.f32.mxu0 %vm659_vm0, %v658_v1  ;;  %v322_v3 = vld [vmem:[%s879_s3 + $0x78] sm:$0xff]  ;;  %v321_v4 = vld [vmem:[%s879_s3 + $0x70] sm:$0xff]  ;;  %v320_v6 = vld [vmem:[%s879_s3 + $0x68] sm:$0xff]  ;;  %vm232_vm1 = vcmask 261120   ;;  %p598_p12 = pnand %p597_p11, %p729_p5  ;;  %s660_s22 = smov [#allocation2]  }
  0x15   : > { %510 = vmatpush3.msra.mxu0 %v224_v0  ;;  %520 = vmatprep.subr.mxu1 %v658_v1  ;;  %s479_s16 = sshll.u32 %s217_s11, 3  ;;  %v221_v7 = vld [vmem:[%s877_s1] sm:$0xff]  ;;  %v318_v10 = vld [vmem:[%s879_s3 + $0x58] sm:$0xff]  ;;  %v317_v11 = vld [vmem:[%s879_s3 + $0x50] sm:$0xff] }
  0x16   : > { %511 = vmatprep.subr.mxu0 %v658_v1  ;;  %521 = vmatpush3.msra.mxu1 %v322_v3  ;;  %s219_s7 = scalar_lea.vmem %s876_s0, %s479_s16  ;;  %v319_v9 = vld [vmem:[%s879_s3 + $0x60] sm:$0xff]  ;;  %v316_v12 = vld [vmem:[%s879_s3 + $0x48] sm:$0xff]  ;;  %v314_v14 = vld [vmem:[%s879_s3 + $0x38] sm:$0xff]  ;;  %p599_p13 = pneg %p598_p12 }
  0x17   : > { %512 = vmatpush3.msra.mxu0 %v223_v2  ;;  %522 = vmatprep.subr.mxu1 %v658_v1  ;;  %v220_v8 = vld [vmem:[%s219_s7] sm:$0xff]  ;;  %v313_v15 = vld [vmem:[%s879_s3 + $0x30] sm:$0xff]  ;;  %v312_v16 = vld [vmem:[%s879_s3 + $0x28] sm:$0xff]  ;;  %s600_s16 = sshll.u32 %s660_s22, 4  ;;  %s601_s16 = int_to_ptr.vmem [resolvable:$false] %s600_s16 }
  0x18   : > { %513 = vmatprep.subr.mxu0 %v658_v1  ;;  %523 = vmatpush3.msra.mxu1 %v321_v4  ;;  %v315_v13 = vld [vmem:[%s879_s3 + $0x40] sm:$0xff]  ;;  %v310_v18 = vld [vmem:[%s879_s3 + $0x18] sm:$0xff]  ;;  %v309_v19 = vld [vmem:[%s879_s3 + $0x10] sm:$0xff]  ;;  %s602_s17 = scalar_lea.vmem %s601_s16, 256  ;;  %p603_p0 = scmp.lt.s32.totalorder %s416_s10, %s601_s16 }
  0x19   : > { %514 = vmatpush3.msra.mxu0 %v222_v5  ;;  %524 = vmatprep.subr.mxu1 %v658_v1  ;;  %v311_v17 = vld [vmem:[%s879_s3 + $0x20] sm:$0xff]  ;;  %v308_v20 = vld [vmem:[%s879_s3 + $0x8] sm:$0xff]  ;;  %p604_p1 = scmp.lt.s32.totalorder %s602_s17, %s596_s15 }
  0x1a   : > { %515 = vmatprep.subr.mxu0 %v658_v1  ;;  %525 = vmatpush3.msra.mxu1 %v320_v6  ;;  %v307_v21 = vld [vmem:[%s879_s3] sm:$0xff] }
  0x1b   : > { %516 = vmatpush3.msra.mxu0 %v221_v7  ;;  %526 = vmatprep.subr.mxu1 %v658_v1  ;;  %v480_v22 = vld [vmem:[%s878_s2] ss:$0 sm:$0xff]  ;;  %p605_p2 = por %p604_p1, %p603_p0 }
  0x1c   : > { %518 = vmatmul.mubr.msk.f32.vlgmr.msra.gmra.mxu0 %vm232_vm1, %v220_v8  ;;  %527 = vmatpush3.msra.mxu1 %v319_v9  ;;  %v482_v27 = vld [vmem:[%s880_s4] ss:$0 sm:$0xff] }
  0x1d   : > { %528 = vmatprep.subr.mxu1 %v658_v1  ;;  %552 = vmatprep.mubr.msk.f32.mxu1 %vm659_vm0, %v658_v1  ;;  %p606_p3 = pnand %p605_p2, %p599_p13 }
  0x1e   : > { %529 = vmatpush3.msra.mxu1 %v318_v10 }
  0x1f   : > { %530 = vmatprep.subr.mxu1 %v658_v1 }
  0x20   : > { %531 = vmatpush3.msra.mxu1 %v317_v11 }
  0x21   : > { %532 = vmatprep.subr.mxu1 %v658_v1 }
  0x22   : > { %533 = vmatpush3.msra.mxu1 %v316_v12 }
  0x23   : > { %534 = vmatprep.subr.mxu1 %v658_v1 }
  0x24   : > { %535 = vmatpush3.msra.mxu1 %v315_v13 }
  0x25   : > { %536 = vmatprep.subr.mxu1 %v658_v1 }
  0x26   : > { %537 = vmatpush3.msra.mxu1 %v314_v14 }
  0x27   : > { %538 = vmatprep.subr.mxu1 %v658_v1 }
  0x28   : > { %539 = vmatpush3.msra.mxu1 %v313_v15 }
  0x29   : > { %540 = vmatprep.subr.mxu1 %v658_v1 }
  0x2a   : > { %541 = vmatpush3.msra.mxu1 %v312_v16 }
  0x2b   : > { %542 = vmatprep.subr.mxu1 %v658_v1 }
  0x2c   : > { %543 = vmatpush3.msra.mxu1 %v311_v17 }
  0x2d   : > { %544 = vmatprep.subr.mxu1 %v658_v1 }
  0x2e   : > { %545 = vmatpush3.msra.mxu1 %v310_v18 }
  0x2f   : > { %546 = vmatprep.subr.mxu1 %v658_v1 }
  0x30   : > { %547 = vmatpush3.msra.mxu1 %v309_v19 }
  0x31   : > { %548 = vmatprep.subr.mxu1 %v658_v1 }
  0x32   : > { %549 = vmatpush3.msra.mxu1 %v308_v20 }
  0x33   : > { %550 = vmatprep.subr.mxu1 %v658_v1 }
  0x34   : > { %551 = vmatpush3.msra.mxu1 %v307_v21 }
  0xdc   : > { %v302_v23 = vpop.f32.mrf.mxu0 }
  0xdd   : > { %v303_v24 = vadd.f32 %v480_v22, %v302_v23 }
  0xde   : > { %v519_v25 = vpop.f32.mrf.mxu0 }
  0xdf   : > { %v306_v26 = vmax.f32 %v303_v24, 0.0 }
  0xe1   : > { %553 = vmatmul.mubr.f32.vlgmr.msra.gmra.mxu1 %v306_v26 }
 0x1a1   : > { %v396_v28 = vpop.f32.mrf.mxu1 }
 0x1a2   : > { %v397_v29 = vadd.f32 %v482_v27, %v396_v28 }
 0x1a3   : > { %v554_v30 = vpop.f32.mrf.mxu1 }
 0x1a4   : > { %400 = vst.msk [vmem:[%s215_s9] sm:$0xff] %vm232_vm1, %v397_v29 }
 0x1a5   : > { %609 = shalt.err (!%p606_p3)
}
 0x1a6   : > { %s610_s23 = scalar_lea.hbm %s840_s13, 128  ;;  %s614_s30 = scalar_lea.hbm %s881_s5, 256 }
 0x1a7   : > { %p611_p4 = scmp.ne.s32.totalorder %s840_s13, %s610_s23  ;;  %p615_p9 = scmp.lt.s32.totalorder %s840_s13, %s881_s5 }
 0x1a8   : > { %p616_p10 = scmp.lt.s32.totalorder %s614_s30, %s610_s23 }
 0x1a9   : > { %p612_p7 = pnand %p611_p4, %p729_p5 }
 0x1aa   : > { %p617_p11 = por %p616_p10, %p615_p9 }
 0x1ab   : > { %p613_p8 = pneg %p612_p7 }
 0x1ad   : > { %p618_p12 = pnand %p617_p11, %p613_p8 }
 0x1af   : > { %621 = shalt.err (!%p618_p12)
}
 0x1b0   : > { %555 = dma.vmem_to_hbm [thread:$0]  (%p729_p5), %s416_s10, 128, %s840_s13, %s402_s14  }
 0x1b1 PF: > { %p561_p13 = scmp.ge.s32.totalorder %s656_s21, 2  ;;  %s427_s8 = sand.u32 1, %s644_s18  }
 0x1b2   : > { %s428_s9 = scalar_lea.sflag [#allocation3], %s427_s8 }
 0x1b3   : > { %p558_p0 = pnand %p561_p13, %p733_p6 }
 0x1b5   : > { %p559_p1 = pneg %p558_p0 }
 0x1b7   : > { %639 = dma.done.wait (%p559_p1), %s428_s9, 128  }
 0x1b8   : > { %641 = vsyncadd (%p559_p1), %s428_s9, 4294967168  ;;  %p15_p2 = scmp.ge.s32.totalorder %s716_s24, 4   ;;  %s884_s18 = smov %s648_s19 }
 0x1b9   : > { %s885_s19 = smov %s652_s20  ;;  %s886_s20 = smov %s727_s27 }
 0x1ba   : > { %s887_s21 = smov %s716_s24  ;;  %17 = sbr.rel (!%p15_p2) target bundleno = 3 (0x3), region = 75 }
 0x1bf   :  { %433 = vsyncpa [#allocation3], 1 }
 0x1c0   :  { %435 = vsyncpa [#allocation3 + $0x1], 1 }

</bundles_post_ra>
